<compile_context>
chip_gen: v7x
topology: tpu7x:2x2x1
jax: 0.10.0
libtpu: 0.0.40
codegen_flags: <defaults>
</compile_context>

<pallas_src>
import jax
import jax.numpy as jnp
from jax.experimental import pallas as pl
from jax.experimental.pallas import tpu as pltpu


def _round_up(n, m):
    return (n + m - 1) // m * m


# ---------------------------------------------------------------------------
# Fast path: table resident in VMEM, gather via a one-hot MXU matmul.
# ---------------------------------------------------------------------------
def _embedding_onehot_kernel(ids_ref, table_ref, emb_ref):
    # ids_ref  : (tile, 1) int32  VMEM   token ids of this tile
    # table_ref: (V, E)    f32    VMEM   full table (constant block -> resident)
    # emb_ref  : (tile, E) f32    VMEM   output block
    tile = emb_ref.shape[0]
    V = table_ref.shape[0]
    ids = ids_ref[...]                                           # (tile, 1)
    iota = jax.lax.broadcasted_iota(jnp.int32, (tile, V), 1)     # (tile, V)
    onehot = (ids == iota).astype(table_ref.dtype)               # (tile, V)
    # HIGHEST precision keeps the f32 one-hot gather exact (picks a single row).
    emb_ref[...] = jnp.dot(
        onehot,
        table_ref[...],
        precision=jax.lax.Precision.HIGHEST,
        preferred_element_type=jnp.float32,
    ).astype(emb_ref.dtype)


def _embedding_vmem_onehot(x, table, *, tile=None):
    B, S = x.shape
    V, E = table.shape
    N = B * S
    if tile is None:
        tile = min(512, _round_up(N, 8))
    n_tiles = pl.cdiv(N, tile)
    n_pad = n_tiles * tile
    ids = jnp.pad(x.reshape(N).astype(jnp.int32), (0, n_pad - N)).reshape(n_pad, 1)

    grid_spec = pl.GridSpec(
        grid=(n_tiles,),
        in_specs=[
            pl.BlockSpec((tile, 1), lambda i: (i, 0)),   # per-tile token ids
            pl.BlockSpec((V, E), lambda i: (0, 0)),      # full table, VMEM-resident
        ],
        out_specs=pl.BlockSpec((tile, E), lambda i: (i, 0)),
    )
    emb_pad = pl.pallas_call(
        _embedding_onehot_kernel,
        grid_spec=grid_spec,
        out_shape=jax.ShapeDtypeStruct((n_pad, E), table.dtype),
        compiler_params=pltpu.CompilerParams(
            dimension_semantics=("parallel",) if n_tiles > 1 else ("arbitrary",),
            vmem_limit_bytes=32 * 1024 * 1024,
        ),
    )(ids, table)
    return emb_pad[:N].reshape(B, S, E)


# ---------------------------------------------------------------------------
# Large-table path: table stays in HBM, per-row DMAs land directly in the
# output block; padding tokens are skipped.
# ---------------------------------------------------------------------------
def _embedding_dma_gather_kernel(tok_smem, table_hbm, emb_ref, sem):
    # tok_smem : (N_pad,) int32 SMEM   scalar-prefetched token ids
    # table_hbm: (V, E)   f32   HBM    (memory_space=pl.ANY, never fully loaded)
    # emb_ref  : (tile,E) f32   VMEM   output block; rows are DMA'd straight here
    # sem      : (1,)           shared DMA semaphore
    i = pl.program_id(0)
    tile = emb_ref.shape[0]
    base = i * tile

    # Padding tokens issue no DMA; pre-zero the block (row 0 of the table is
    # all-zero by the padding_idx=0 invariant, so this matches the gather).
    emb_ref[...] = jnp.zeros_like(emb_ref)

    def _issue(j, carry):
        row = tok_smem[base + j]

        @pl.when(row != 0)
        def _():
            pltpu.make_async_copy(table_hbm.at[row], emb_ref.at[j],
                                  sem.at[0]).start()

        return carry

    def _drain(j, carry):
        row = tok_smem[base + j]

        @pl.when(row != 0)
        def _():
            # Same guard and same descriptor as the issue, so the number of
            # waits and the byte counts match exactly; all gathers complete
            # before the output block is written back.
            pltpu.make_async_copy(table_hbm.at[row], emb_ref.at[j],
                                  sem.at[0]).wait()

        return carry

    # Issue every row DMA for this tile back-to-back (all kept in flight),
    # then drain them. Unrolling lets the scalar loads / address math pipeline.
    jax.lax.fori_loop(0, tile, _issue, 0, unroll=8)
    jax.lax.fori_loop(0, tile, _drain, 0, unroll=8)


def _embedding_hbm_gather(x, table, *, tile=None):
    B, S = x.shape
    V, E = table.shape
    N = B * S
    if tile is None:
        # Keep the double-buffered (tile, E) f32 output block ~<= 8 MiB (v7x-safe).
        cap = max(8, ((8 << 20) // (2 * E * 4)) // 8 * 8)
        tile = min(512, cap)
    tile = min(tile, _round_up(N, 8))
    n_tiles = pl.cdiv(N, tile)
    n_pad = n_tiles * tile
    # TODO(synk): chunk the pallas_call (or window the ids via an SMEM BlockSpec)
    # for > ~128K tokens; 1-D SMEM arrays pad to the next power of two.
    assert n_pad <= 128 * 1024, "token-id array too large for scalar prefetch"

    tok_flat = jnp.pad(x.reshape(N).astype(jnp.int32), (0, n_pad - N))

    grid_spec = pltpu.PrefetchScalarGridSpec(
        num_scalar_prefetch=1,                          # tok_flat -> SMEM
        grid=(n_tiles,),
        in_specs=[pl.BlockSpec(memory_space=pl.ANY)],   # table stays in HBM
        out_specs=pl.BlockSpec((tile, E), lambda i, tok: (i, 0)),
        scratch_shapes=[pltpu.SemaphoreType.DMA((1,))],
    )
    emb_pad = pl.pallas_call(
        _embedding_dma_gather_kernel,
        grid_spec=grid_spec,
        out_shape=jax.ShapeDtypeStruct((n_pad, E), table.dtype),
        compiler_params=pltpu.CompilerParams(
            dimension_semantics=("parallel",) if n_tiles > 1 else ("arbitrary",),
            vmem_limit_bytes=32 * 1024 * 1024,
        ),
    )(tok_flat, table)
    return emb_pad[:N].reshape(B, S, E)


# ---------------------------------------------------------------------------
# Public forward: matches torch Embedding(padding_idx=0) forward.
# ---------------------------------------------------------------------------
def embedding_forward(x, table, *, tile=None, force_hbm_gather=False):
    """x: (B, S) int token ids (0 = padding); table: (V, E) f32 with row 0 == 0.

    Returns (embeddings (B, S, E), mask (B, S))."""
    V, E = table.shape
    # Padding mask in plain JAX (perf review: keep sub-(8,128) blocks out of the
    # kernel; XLA fuses this compare for free).
    mask = (x != 0).astype(jnp.float32)

    table_bytes = V * E * table.dtype.itemsize
    small_table = (table_bytes <= 4 * 1024 * 1024) and (V <= 2048)
    if small_table and not force_hbm_gather:
        emb = _embedding_vmem_onehot(x, table, tile=tile)
    else:
        emb = _embedding_hbm_gather(x, table, tile=tile)
    return emb, mask


if __name__ == "__main__":
    key = jax.random.PRNGKey(0)
    k_tab, k_tok = jax.random.split(key)

    vocab_size = 50
    embedding_size = 32
    batch, seq = 2, 8

    # Deterministic parameter init (torch.nn.Embedding ~ N(0,1); row 0 zeroed
    # because padding_idx=0).
    table = jax.random.normal(k_tab, (vocab_size, embedding_size), jnp.float32)
    table = table.at[0].set(0.0)

    # Token ids, post-padded with zeros.
    x = jax.random.randint(k_tok, (batch, seq), 1, vocab_size, jnp.int32)
    x = x.at[0, 6:].set(0)
    x = x.at[1, 4:].set(0)

    # Fast path (table resident in VMEM, one-hot MXU gather) -- demo default.
    emb, mask = embedding_forward(x, table)
    # Large-table path (HBM row-DMA gather), forced to exercise it at demo shapes.
    emb_hbm, mask_hbm = embedding_forward(x, table, force_hbm_gather=True)
    jax.block_until_ready((emb, mask, emb_hbm, mask_hbm))

    # Cross-check against plain-JAX reference.
    ref_emb = jnp.take(table, x, axis=0)
    ref_mask = (x != 0).astype(jnp.float32)
    assert emb.shape == (batch, seq, embedding_size)
    assert mask.shape == (batch, seq)
    assert jnp.allclose(emb, ref_emb, rtol=1e-6, atol=1e-6)   # one-hot MXU gather
    assert jnp.array_equal(emb_hbm, ref_emb)                  # DMA gather is exact
    assert jnp.array_equal(mask, ref_mask)
    assert jnp.array_equal(mask_hbm, ref_mask)

    print("KERNEL_OK")
</pallas_src>

<mosaic_0001>
module attributes {stable_mosaic.version = 11 : i64} {
  func.func @_embedding_onehot_kernel(%arg0: i32, %arg1: memref<16x1xi32, #tpu.memory_space<vmem>>, %arg2: memref<50x32xf32, #tpu.memory_space<vmem>>, %arg3: memref<16x32xf32, #tpu.memory_space<vmem>>) attributes {dimension_semantics = [#tpu.dimension_semantics<arbitrary>], iteration_bounds = array<i64: 1>, scalar_prefetch = 0 : i64, scratch_operands = 0 : i64, tpu.core_type = #tpu.core_type<tc>, window_params = [{transform_indices = @transform_0, window_bounds = array<i64: 16, 1>}, {pipeline_mode = #tpu.pipeline_mode<synchronous>, transform_indices = @transform_1, window_bounds = array<i64: 50, 32>}, {transform_indices = @transform_2, window_bounds = array<i64: 16, 32>}]} {
    %c0 = arith.constant 0 : index
    %c0_0 = arith.constant 0 : index
    %0 = vector.load %arg1[%c0, %c0_0] : memref<16x1xi32, #tpu.memory_space<vmem>>, vector<16x1xi32>
    %1 = tpu.iota {dimensions = array<i32: 1>} : vector<16x50xi32>
    %2 = vector.broadcast %0 : vector<16x1xi32> to vector<16x50xi32>
    %3 = arith.cmpi eq, %2, %1 : vector<16x50xi32>
    %4 = arith.extui %3 : vector<16x50xi1> to vector<16x50xi32>
    %5 = arith.sitofp %4 : vector<16x50xi32> to vector<16x50xf32>
    %c0_1 = arith.constant 0 : index
    %c0_2 = arith.constant 0 : index
    %6 = vector.load %arg2[%c0_1, %c0_2] : memref<50x32xf32, #tpu.memory_space<vmem>>, vector<50x32xf32>
    %cst = arith.constant dense<0.000000e+00> : vector<16x32xf32>
    %7 = tpu.matmul %5, %6, %cst {dimension_numbers = #tpu.dot_dimension_numbers<[1], [0], [0], [1], [0, 0, 1, 1], [], []>, precision = #tpu.contract_precision<fp32>} : vector<16x50xf32>, vector<50x32xf32>, vector<16x32xf32> -> vector<16x32xf32>
    %c0_3 = arith.constant 0 : index
    %c0_4 = arith.constant 0 : index
    %8 = vector.load %arg3[%c0_3, %c0_4] : memref<16x32xf32, #tpu.memory_space<vmem>>, vector<16x32xf32>
    tpu.vector_store %arg3[%c0_3, %c0_4], %7 {strides = array<i32>} : memref<16x32xf32, #tpu.memory_space<vmem>>, vector<16x32xf32>,
    return
  }
  func.func @transform_0(%arg0: i32) -> (i32, i32) {
    %c0_i32 = arith.constant 0 : i32
    %c0_i32_0 = arith.constant 0 : i32
    return %arg0, %c0_i32 : i32, i32
  }
  func.func @transform_1(%arg0: i32) -> (i32, i32) {
    %c0_i32 = arith.constant 0 : i32
    %c0_i32_0 = arith.constant 0 : i32
    %c0_i32_1 = arith.constant 0 : i32
    return %c0_i32, %c0_i32_0 : i32, i32
  }
  func.func @transform_2(%arg0: i32) -> (i32, i32) {
    %c0_i32 = arith.constant 0 : i32
    %c0_i32_0 = arith.constant 0 : i32
    return %arg0, %c0_i32 : i32, i32
  }
}

</mosaic_0001>

<bundles_post_ra>
// kernel: tpu_custom_call.1
= control target key start
LH: loop header
LB: loop body
LE: loop exit
PB: predicated region body
PF: predicated region fallthrough
CT: control target
= control target key end

     0   :  { %v908_v2 = vmov 0   ;;  %s1012_s0 = inlined_call_operand.vmem [shape: s32[16,1], index: 0, kind: input, shape index: {}]   ;;  %s1013_s1 = inlined_call_operand.vmem [shape: f32[50,32], index: 1, kind: input, shape index: {}]   ;;  %s1014_s2 = inlined_call_operand.hbm [shape: f32[16,32], index: 2, kind: output, shape index: {}]  }
   0x1   :  { %v12_v0 = vld [vmem:[%s1012_s0] sm:$0xff]  ;;  %883 = vset.pattern.permute.xlu0 %v908_v2  ;;  %v29_v3 = vld [vmem:[%s1013_s1 + $0x8] sm:$0xff]  ;;  %v30_v5 = vld [vmem:[%s1013_s1 + $0x10] sm:$0xff] }
   0x2   :  { %v28_v1 = vld [vmem:[%s1013_s1] sm:$0xff]  ;;  %v31_v6 = vld [vmem:[%s1013_s1 + $0x18] sm:$0xff]  ;;  %17 = vperm.xlu0 %883, %v12_v0   ;;  %v50_v7 = vand.u32 4294901760, %v29_v3  ;;  %v53_v8 = vand.u32 4294901760, %v30_v5  ;;  %v33_v11 = vld [vmem:[%s1013_s1 + $0x28] sm:$0xff] }
   0x3   :  { %v47_v4 = vand.u32 4294901760, %v28_v1  ;;  %v56_v9 = vand.u32 4294901760, %v31_v6  ;;  %v32_v10 = vld [vmem:[%s1013_s1 + $0x20] sm:$0xff]  ;;  %v13_v12 = vld [vmem:[%s1012_s0 + $0x8] sm:$0xff] }
   0x4   :  { %7 = vsyncpa [#allocation3], 0  ;;  %v59_v15 = vand.u32 4294901760, %v32_v10  ;;  %v62_v16 = vand.u32 4294901760, %v33_v11  ;;  %v34_v17 = vld [vmem:[%s1013_s1 + $0x30] sm:$0x3]  ;;  %v147_v19 = vsub.f32 %v29_v3, %v50_v7  ;;  %v154_v26 = vsub.f32 %v30_v5, %v53_v8 }
   0x5   :  { %v952_v13 = vpack.c.bf16 %v50_v7, %v47_v4  ;;  %v954_v14 = vpack.c.bf16 %v56_v9, %v53_v8  ;;  %vm42_vm0 = vcmask 1041408   ;;  %v140_v18 = vsub.f32 %v28_v1, %v47_v4  ;;  %s910_s0 = smov [#allocation2]  }
   0x6   :  { %20 = vperm.xlu0 %883, %v13_v12   ;;  %v964_v20 = vpack.c.bf16 %v62_v16, %v59_v15  ;;  %v148_v22 = vand.u32 4294901760, %v147_v19  ;;  %v967_v23 = vsel %vm42_vm0, %v34_v17, 0  ;;  %v161_v27 = vsub.f32 %v31_v6, %v56_v9  ;;  %s621_s1 = sshll.u32 %s910_s0, 4  ;;  %s622_s1 = int_to_ptr.vmem [resolvable:$true] %s621_s1 }
   0x7   :  { %833 = vmatprep.subr.bf16.mxu0 %v952_v13  ;;  %797 = vmatprep.subr.bf16.mxu1 %v952_v13  ;;  %v141_v21 = vand.u32 4294901760, %v140_v18  ;;  %v973_v28 = vand.u32 4294901760, %v967_v23  ;;  %v155_v31 = vand.u32 4294901760, %v154_v26  ;;  %v168_v37 = vsub.f32 %v32_v10, %v59_v15  ;;  %s884_s27 = scalar_lea.vmem %s622_s1, 256  ;;  %p889_p1 = scmp.lt.s32.totalorder %s622_s1, %s622_s1 }
   0x8   :  { %835 = vmatpush3.bf16.msra.mxu0 %v952_v13  ;;  %799 = vmatpush3.bf16.msra.mxu1 %v952_v13  ;;  %v149_v25 = vsub.f32 %v147_v19, %v148_v22  ;;  %v162_v32 = vand.u32 4294901760, %v161_v27  ;;  %v175_v38 = vsub.f32 %v33_v11, %v62_v16  ;;  %v820_v51 = vpack.c.bf16 %v147_v19, %v140_v18  ;;  %p885_p0 = scmp.ne.s32.totalorder %s622_s1, %s884_s27  ;;  %p890_p2 = scmp.lt.s32.totalorder %s884_s27, %s884_s27 }
   0x9   :  { %837 = vmatprep.subr.bf16.mxu0 %v954_v14  ;;  %801 = vmatprep.subr.bf16.mxu1 %v954_v14  ;;  %v142_v24 = vsub.f32 %v140_v18, %v141_v21  ;;  %v156_v34 = vsub.f32 %v154_v26, %v155_v31  ;;  %v844_v36 = vpack.c.bf16 %v148_v22, %v141_v21  ;;  %v169_v42 = vand.u32 4294901760, %v168_v37 }
   0xa   :  { %v150_v30 = vand.u32 4294901760, %v149_v25  ;;  %v848_v33 = vpack.c.bf16 %v162_v32, %v155_v31  ;;  %v163_v35 = vsub.f32 %v161_v27, %v162_v32  ;;  %v176_v43 = vand.u32 4294901760, %v175_v38  ;;  %p891_p3 = por %p890_p2, %p889_p1 }
   0xb   :  { %v143_v29 = vand.u32 4294901760, %v142_v24  ;;  %v157_v40 = vand.u32 4294901760, %v156_v34  ;;  %v170_v46 = vsub.f32 %v168_v37, %v169_v42  ;;  %v824_v52 = vpack.c.bf16 %v161_v27, %v154_v26 }
   0xc   :  { %839 = vmatpush3.bf16.msra.mxu0 %v954_v14  ;;  %803 = vmatpush3.bf16.msra.mxu1 %v954_v14  ;;  %v164_v41 = vand.u32 4294901760, %v163_v35  ;;  %v852_v45 = vpack.c.bf16 %v176_v43, %v169_v42  ;;  %v177_v47 = vsub.f32 %v175_v38, %v176_v43  ;;  %v828_v53 = vpack.c.bf16 %v175_v38, %v168_v37  ;;  %p892_p4 = pnand %p891_p3, %p885_p0 }
   0xd   :  { %841 = vmatprep.subr.bf16.mxu0 %v964_v20  ;;  %805 = vmatprep.subr.bf16.mxu1 %v964_v20  ;;  %v808_v39 = vpack.c.bf16 %v150_v30, %v143_v29  ;;  %v171_v48 = vand.u32 4294901760, %v170_v46  ;;  %v14_v54 = vlaneseq  ;;  %vm35_vm1 = vcmask 408576  }
   0xe   :  { %v812_v44 = vpack.c.bf16 %v164_v41, %v157_v40  ;;  %v178_v49 = vand.u32 4294901760, %v177_v47  ;;  %v909_v57 = vmov 0.0   ;;  %v182_v6 = vsub.f32 %v967_v23, %v973_v28 }
   0xf   :  { %v15_v55 = vand.u32 127, %v14_v54  ;;  %vm613_vm4 = vcmask 261120  }
  0x10   :  { %843 = vmatpush3.bf16.msra.mxu0 %v964_v20  ;;  %807 = vmatpush3.bf16.msra.mxu1 %v964_v20  ;;  %v816_v50 = vpack.c.bf16 %v178_v49, %v171_v48  ;;  %v183_v8 = vand.u32 4294901760, %v182_v6 }
  0x11   :  { %757 = vmatprep.subr.mxu0 %v973_v28  ;;  %706 = vmatprep.subr.mxu1 %v973_v28 }
  0x12   :  { %v184_v9 = vsub.f32 %v182_v6, %v183_v8 }
  0x14   :  { %758 = vmatpush3.msra.mxu0 %v973_v28  ;;  %707 = vmatpush3.msra.mxu1 %v973_v28  ;;  %v185_v10 = vand.u32 4294901760, %v184_v9 }
  0x15   :  { %845 = vmatprep.subr.bf16.mxu0 %v844_v36  ;;  %809 = vmatprep.subr.bf16.mxu1 %v808_v39 }
  0x81   :  { %v18_v56 = vpop.permute.xlu0 %17 }
  0x82   :  { %vm22_vm2 = vcmp.eq.s32.totalorder %v18_v56, %v15_v55 }
  0x83   :  { %v632_v58 = vsel %vm22_vm2, 1.0, %v909_v57 }
  0x84   :  { %v37_v59 = vsel %vm35_vm1, %v632_v58, 0 }
  0x85   :  { %v119_v60 = vsub.f32 %v37_v59, %v37_v59  ;;  %v21_v61 = vpop.permute.xlu0 %20 }
  0x86   :  { %vm23_vm3 = vcmp.eq.s32.totalorder %v21_v61, %v15_v55 }
  0x87   :  { %v633_v62 = vsel %vm23_vm3, 1.0, %v909_v57  ;;  %v120_v63 = vand.u32 4294901760, %v119_v60 }
  0x88   :  { %v40_v0 = vsel %vm35_vm1, %v633_v62, 0 }
  0x89   :  { %v129_v1 = vsub.f32 %v40_v0, %v40_v0  ;;  %759 = vmatprep.mubr.f32.mxu0 %v120_v63  ;;  %v121_v2 = vsub.f32 %v119_v60, %v120_v63 }
  0x8b   :  { %v122_v3 = vand.u32 4294901760, %v121_v2  ;;  %v130_v4 = vand.u32 4294901760, %v129_v1 }
  0x8d   :  { %708 = vmatprep.mubr.f32.mxu1 %v122_v3  ;;  %760 = vmatmul.mubr.f32.vlgmr.msra.gmra.mrb[0].mxu0 %v130_v4  ;;  %v131_v5 = vsub.f32 %v129_v1, %v130_v4 }
  0x8e   :  { %847 = vmatpush3.bf16.msra.mxu0 %v844_v36  ;;  %776 = vmatprep.mubr.msk.f32.mxu0 %vm35_vm1, %v632_v58 }
  0x8f   :  { %849 = vmatprep.subr.bf16.mxu0 %v848_v33  ;;  %v132_v7 = vand.u32 4294901760, %v131_v5 }
  0x91   :  { %709 = vmatmul.mubr.f32.vlgmr.msra.gmra.mrb[0].mxu1 %v132_v7 }
  0x92   :  { %811 = vmatpush3.bf16.msra.mxu1 %v808_v39  ;;  %851 = vmatpush3.bf16.msra.mxu0 %v848_v33 }
  0x93   :  { %725 = vmatprep.mubr.msk.f32.mxu1 %vm35_vm1, %v632_v58  ;;  %813 = vmatprep.subr.bf16.mxu1 %v812_v44 }
  0x94   :  { %853 = vmatprep.subr.bf16.mxu0 %v852_v45 }
  0x96   :  { %815 = vmatpush3.bf16.msra.mxu1 %v812_v44  ;;  %855 = vmatpush3.bf16.msra.mxu0 %v852_v45 }
  0x97   :  { %817 = vmatprep.subr.bf16.mxu1 %v816_v50  ;;  %774 = vmatprep.subr.mxu0 %v183_v8 }
  0x9a   :  { %819 = vmatpush3.bf16.msra.mxu1 %v816_v50  ;;  %775 = vmatpush3.msra.mxu0 %v183_v8 }
  0x9b   :  { %777 = vmatmul.mubr.msk.f32.vlgmr.msra.gmra.mrb[0].mxu0 %vm35_vm1, %v633_v62  ;;  %857 = vmatprep.subr.bf16.mxu0 %v952_v13 }
  0x9c   :  { %859 = vmatpush3.bf16.msra.mxu0 %v952_v13  ;;  %793 = vmatprep.mubr.msk.f32.mxu0 %vm35_vm1, %v632_v58 }
  0x9d   :  { %723 = vmatprep.subr.mxu1 %v185_v10  ;;  %861 = vmatprep.subr.bf16.mxu0 %v954_v14 }
  0x9e   :  { %724 = vmatpush3.msra.mxu1 %v185_v10 }
  0x9f   :  { %726 = vmatmul.mubr.msk.f32.vlgmr.msra.gmra.mrb[0].mxu1 %vm35_vm1, %v633_v62  ;;  %821 = vmatprep.subr.bf16.mxu1 %v820_v51 }
  0xa0   :  { %823 = vmatpush3.bf16.msra.mxu1 %v820_v51  ;;  %742 = vmatprep.mubr.f32.mxu1 %v119_v60 }
  0xa1   :  { %863 = vmatpush3.bf16.msra.mxu0 %v954_v14  ;;  %825 = vmatprep.subr.bf16.mxu1 %v824_v52 }
  0xa2   :  { %865 = vmatprep.subr.bf16.mxu0 %v964_v20 }
  0xa4   :  { %827 = vmatpush3.bf16.msra.mxu1 %v824_v52 }
  0xa5   :  { %867 = vmatpush3.bf16.msra.mxu0 %v964_v20  ;;  %829 = vmatprep.subr.bf16.mxu1 %v828_v53 }
  0xa6   :  { %791 = vmatprep.subr.mxu0 %v973_v28 }
  0xa8   :  { %831 = vmatpush3.bf16.msra.mxu1 %v828_v53 }
  0xa9   :  { %792 = vmatpush3.msra.mxu0 %v973_v28  ;;  %740 = vmatprep.subr.mxu1 %v182_v6 }
  0xaa   :  { %794 = vmatmul.mubr.msk.f32.vlgmr.msra.gmra.mrb[0].mxu0 %vm35_vm1, %v633_v62 }
  0xac   :  { %741 = vmatpush3.msra.mxu1 %v182_v6 }
  0xad   :  { %743 = vmatmul.mubr.f32.vlgmr.msra.gmra.mrb[0].mxu1 %v129_v1 }
 0x17d   :  { %v795_v11 = vpop.f32.mrb[0].mxu0 }
 0x17e   :  { %v603_v12 = vpop.f32.mrb[1].mxu0 }
 0x180   :  { %v744_v13 = vpop.f32.mrb[0].mxu1 }
 0x181   :  { %v868_v14 = vadd.f32 %v795_v11, %v744_v13  ;;  %v332_v15 = vpop.f32.mrb[1].mxu1 }
 0x182   :  { %v869_v16 = vadd.f32 %v603_v12, %v332_v15 }
 0x183   :  { %615 = vst.msk [vmem:[#allocation2 + $0x8] sm:$0xff] %vm613_vm4, %v868_v14 }
 0x184   :  { %614 = vst.msk [vmem:[#allocation2] sm:$0xff] %vm613_vm4, %v869_v16 }
 0x185   :  { %895 = shalt.err (!%p892_p4)
}
 0x186   :  { %s896_s30 = scalar_lea.hbm %s1014_s2, 256 }
 0x187   :  { %p897_p5 = scmp.ne.s32.totalorder %s1014_s2, %s896_s30  ;;  %p900_p6 = scmp.lt.u32.totalorder %s896_s30, %s1014_s2 }
 0x189   :  { %p902_p7 = pnand %p900_p6, %p897_p5 }
 0x18b   :  { %905 = shalt.err (!%p902_p7)
}
 0x18c   :  { %s911_s7 = smov 128   ;;  %s912_s8 = smov 8  }
 0x18d   :  { %627 = dma.vmem_to_hbm [thread:$0]  %s622_s1, 256, %s1014_s2, [#allocation3], %s911_s7, %s911_s7, %s912_s8  }
 0x18e   :  { %906 = dma.done.wait [#allocation3], 256  }
 0x18f   :  { %907 = vsyncadd [#allocation3], 4294967040 }
 0x190   :  { %631 = vsyncpa [#allocation3], 1 }

</bundles_post_ra>
